<compile_context>
chip_gen: v5e
topology: v5e:2x2
jax: 0.10.0
libtpu: 0.0.40
codegen_flags: <defaults>
</compile_context>

<pallas_src>
import functools

import jax
import jax.numpy as jnp
from jax.experimental import pallas as pl
from jax.experimental.pallas import tpu as pltpu

MARGIN = 0.2
EPS = 1e-8        # F.cosine_similarity default eps
_OUT_LANES = 128  # lane-dense output slab width


def _nce_kernel(a_ref, p_ref, n_ref, out_ref, s_n_ref, w2n_ref, pos_ref, *,
                k_total, k_blk, num_k_blocks, margin):
    k = pl.program_id(1)

    @pl.when(k == 0)
    def _init():
        s_n_ref[...] = jnp.zeros_like(s_n_ref)
        w2n_ref[...] = jnp.zeros_like(w2n_ref)
        # pos_sim once per batch tile, at k == 0, so the small EUP/XLU work
        # overlaps the negatives DMA stream instead of the epilogue.
        a = a_ref[...].astype(jnp.float32)
        p = p_ref[...].astype(jnp.float32)
        w12 = jnp.sum(a * p, axis=1, keepdims=True)
        w1 = jnp.sum(a * a, axis=1, keepdims=True)
        w2 = jnp.sum(p * p, axis=1, keepdims=True)
        pos_ref[...] = w12 * jax.lax.rsqrt(jnp.maximum(w1 * w2, EPS * EPS))

    # Accumulate sum_k n and sum_k n^2 over this (b_tile, K_blk, D) slab.
    n = n_ref[...].astype(jnp.float32)
    if k_total % k_blk != 0:
        # Ragged last K block: zero out rows >= K so edge-block garbage never
        # enters the sums (0 is the identity for both sum and sum-of-squares).
        kk = jax.lax.broadcasted_iota(jnp.int32, n.shape, 1)
        valid = (k * k_blk + kk) < k_total
        n = jnp.where(valid, n, 0.0)
    s_n_ref[...] = s_n_ref[...] + jnp.sum(n, axis=1)        # sum_k negatives
    w2n_ref[...] = w2n_ref[...] + jnp.sum(n * n, axis=1)    # sum_k negatives^2

    @pl.when(k == num_k_blocks - 1)
    def _finalize():
        a = a_ref[...].astype(jnp.float32)                   # resident across k
        s_n = s_n_ref[...]
        w2n = w2n_ref[...]
        # cosine over the K axis: sum_k a*n = a * sum_k n; sum_k a^2 = K * a^2
        numer = a * s_n                                      # (b_tile, D)
        w1n = (a * a) * float(k_total)
        cos_kd = numer * jax.lax.rsqrt(jnp.maximum(w1n * w2n, EPS * EPS))
        neg_sim = jnp.sum(cos_kd, axis=1, keepdims=True) * (1.0 / cos_kd.shape[1])

        losses = jnp.maximum(margin + neg_sim - pos_ref[...], 0.0)   # (b_tile, 1)
        # Lane-dense store of per-example losses (unmasked vst).
        out_ref[...] = jnp.broadcast_to(losses, out_ref.shape)


def _round_up(x, m):
    return (x + m - 1) // m * m


def _vmem_capacity_bytes():
    try:
        return int(pltpu.get_tpu_info().vmem_capacity_bytes)
    except Exception:
        return 64 * 1024 * 1024  # conservative fallback (v7x per-TC VMEM)


def _choose_tiles(B, K, D, neg_itemsize, io_itemsize):
    """Pick (b_tile, k_blk) against a conservative VMEM budget."""
    vmem_cap = _vmem_capacity_bytes()
    # Leave generous headroom for Mosaic temporaries in the finalize block and
    # for the possibility that get_tpu_info() reports per-chip (not per-TC)
    # capacity on v7x.
    budget = min(vmem_cap // 3, 40 * 1024 * 1024)

    if B < 8:
        b_tile = B                              # block dim == full array dim
    else:
        b_full = _round_up(B, 8)
        # Guarantee >= 2 batch tiles whenever possible so the "parallel" batch
        # axis shards across v7x's two TensorCores (neutral on v5e/v6e).
        b_cap = _round_up(-(-B // 2), 8) if b_full >= 16 else b_full
        b_tile = max(8, min(b_cap, 512))

    def bytes_needed(bt, kb):
        neg = 2 * bt * _round_up(kb, 8) * D * neg_itemsize   # double-buffered slab
        anchor_pos = 2 * 2 * bt * D * io_itemsize            # k-invariant inputs
        scratch = 2 * bt * D * 4 + bt * _OUT_LANES * 4       # s_n, w2n, pos_sim
        out = 2 * bt * _OUT_LANES * 4
        return neg + anchor_pos + scratch + out

    # Shrink b_tile first (keeping at least a small K slab streamable) ...
    while B >= 8 and b_tile > 8 and bytes_needed(b_tile, min(K, 8)) > budget:
        b_tile = max(8, (b_tile // 2) // 8 * 8)

    # ... then pick K_blk: whole K if it fits, else largest multiple of 8.
    k_blk = K
    if bytes_needed(b_tile, K) > budget and K > 8:
        avail = max(budget - bytes_needed(b_tile, 0), 0)
        k_blk = avail // max(2 * b_tile * D * neg_itemsize, 1)
        k_blk = max(8, (k_blk // 8) * 8)
        k_blk = min(k_blk, K)

    return b_tile, k_blk, vmem_cap


def nce_loss(anchor, positive, negatives, *, margin=MARGIN):
    # No wrapper-side astype / pad / transpose: the dominant negatives tensor
    # is streamed exactly once from HBM in its native dtype and layout.
    B, D = anchor.shape
    _, K, _ = negatives.shape

    b_tile, k_blk, vmem_cap = _choose_tiles(
        B, K, D, negatives.dtype.itemsize, anchor.dtype.itemsize)

    num_b_tiles = pl.cdiv(B, b_tile)
    num_k_blocks = pl.cdiv(K, k_blk)

    kernel = functools.partial(
        _nce_kernel, k_total=K, k_blk=k_blk,
        num_k_blocks=num_k_blocks, margin=float(margin))

    per_row = pl.pallas_call(
        kernel,
        out_shape=jax.ShapeDtypeStruct((B, _OUT_LANES), jnp.float32),
        grid_spec=pltpu.PrefetchScalarGridSpec(
            num_scalar_prefetch=0,
            grid=(num_b_tiles, num_k_blocks),
            in_specs=[
                # anchor / positive: k-invariant -> fetched once per batch tile.
                pl.BlockSpec((b_tile, D), lambda b, k: (b, 0)),
                pl.BlockSpec((b_tile, D), lambda b, k: (b, 0)),
                # k-th (b_tile, k_blk, D) negatives slab, original (B,K,D) layout.
                pl.BlockSpec((b_tile, k_blk, D), lambda b, k: (b, k, 0)),
            ],
            out_specs=pl.BlockSpec((b_tile, _OUT_LANES), lambda b, k: (b, 0)),
            scratch_shapes=[
                pltpu.VMEM((b_tile, D), jnp.float32),  # sum_k negatives
                pltpu.VMEM((b_tile, D), jnp.float32),  # sum_k negatives^2
                pltpu.VMEM((b_tile, 1), jnp.float32),  # pos_sim
            ],
        ),
        compiler_params=pltpu.CompilerParams(
            dimension_semantics=("parallel", "arbitrary"),
            vmem_limit_bytes=int(min(vmem_cap, 128 * 1024 * 1024)),
        ),
    )(anchor, positive, negatives)

    # Final mean over the true batch (ragged-edge rows, if any, are dropped).
    return jnp.mean(per_row[:B, 0])


def _reference(anchor, positive, negatives):
    # Pure-JAX mirror of the PyTorch module, for validation.
    def cos(x1, x2, axis):
        w12 = jnp.sum(x1 * x2, axis=axis)
        w1 = jnp.sum(x1 * x1, axis=axis)
        w2 = jnp.sum(x2 * x2, axis=axis)
        return w12 / jnp.sqrt(jnp.maximum(w1 * w2, EPS * EPS))

    pos_sim = cos(anchor, positive, axis=1)                              # (B,)
    a_b = jnp.broadcast_to(anchor[:, None, :], negatives.shape)          # (B,K,D)
    neg_sim = cos(a_b, negatives, axis=1).mean(axis=1)                   # (B,)
    return jnp.mean(jnp.maximum(MARGIN + neg_sim - pos_sim, 0.0))


if __name__ == "__main__":
    key = jax.random.PRNGKey(0)
    k1, k2, k3 = jax.random.split(key, 3)
    B, K, D = 8, 4, 128
    anchor = jax.random.normal(k1, (B, D), dtype=jnp.float32)
    positive = jax.random.normal(k2, (B, D), dtype=jnp.float32)
    negatives = jax.random.normal(k3, (B, K, D), dtype=jnp.float32)

    loss = jax.block_until_ready(nce_loss(anchor, positive, negatives))
    ref = jax.block_until_ready(_reference(anchor, positive, negatives))
    assert jnp.allclose(loss, ref, atol=1e-5, rtol=1e-4), (loss, ref)
    print("KERNEL_OK")
</pallas_src>

<mosaic_0001>
module attributes {stable_mosaic.version = 11 : i64} {
  func.func @_nce_kernel(%arg0: i32, %arg1: i32, %arg2: memref<8x128xf32, #tpu.memory_space<vmem>>, %arg3: memref<8x128xf32, #tpu.memory_space<vmem>>, %arg4: memref<8x4x128xf32, #tpu.memory_space<vmem>>, %arg5: memref<8x128xf32, #tpu.memory_space<vmem>>, %arg6: memref<8x128xf32, #tpu.memory_space<vmem>>, %arg7: memref<8x128xf32, #tpu.memory_space<vmem>>, %arg8: memref<8x1xf32, #tpu.memory_space<vmem>>) attributes {dimension_semantics = [#tpu.dimension_semantics<parallel>, #tpu.dimension_semantics<arbitrary>], iteration_bounds = array<i64: 1, 1>, scalar_prefetch = 0 : i64, scratch_operands = 3 : i64, tpu.core_type = #tpu.core_type<tc>, window_params = [{transform_indices = @transform_0, window_bounds = array<i64: 8, 128>}, {transform_indices = @transform_1, window_bounds = array<i64: 8, 128>}, {transform_indices = @transform_2, window_bounds = array<i64: 8, 4, 128>}, {transform_indices = @transform_3, window_bounds = array<i64: 8, 128>}]} {
    %c0_i32 = arith.constant 0 : i32
    %0 = arith.cmpi eq, %arg1, %c0_i32 : i32
    %1 = arith.extui %0 : i1 to i32
    %c0_i32_0 = arith.constant 0 : i32
    %2 = arith.cmpi ne, %1, %c0_i32_0 : i32
    scf.if %2 {
      %cst_14 = arith.constant 0.000000e+00 : f32
      %16 = vector.broadcast %cst_14 : f32 to vector<8x128xf32>
      %c0_15 = arith.constant 0 : index
      %c0_16 = arith.constant 0 : index
      %17 = vector.load %arg6[%c0_15, %c0_16] : memref<8x128xf32, #tpu.memory_space<vmem>>, vector<8x128xf32>
      tpu.vector_store %arg6[%c0_15, %c0_16], %16 {strides = array<i32>} : memref<8x128xf32, #tpu.memory_space<vmem>>, vector<8x128xf32>,
      %cst_17 = arith.constant 0.000000e+00 : f32
      %18 = vector.broadcast %cst_17 : f32 to vector<8x128xf32>
      %c0_18 = arith.constant 0 : index
      %c0_19 = arith.constant 0 : index
      %19 = vector.load %arg7[%c0_18, %c0_19] : memref<8x128xf32, #tpu.memory_space<vmem>>, vector<8x128xf32>
      tpu.vector_store %arg7[%c0_18, %c0_19], %18 {strides = array<i32>} : memref<8x128xf32, #tpu.memory_space<vmem>>, vector<8x128xf32>,
      %c0_20 = arith.constant 0 : index
      %c0_21 = arith.constant 0 : index
      %20 = vector.load %arg2[%c0_20, %c0_21] : memref<8x128xf32, #tpu.memory_space<vmem>>, vector<8x128xf32>
      %c0_22 = arith.constant 0 : index
      %c0_23 = arith.constant 0 : index
      %21 = vector.load %arg3[%c0_22, %c0_23] : memref<8x128xf32, #tpu.memory_space<vmem>>, vector<8x128xf32>
      %22 = arith.mulf %20, %21 : vector<8x128xf32>
      %cst_24 = arith.constant dense<0.000000e+00> : vector<8xf32>
      %23 = vector.multi_reduction <add>, %22, %cst_24 [1] : vector<8x128xf32> to vector<8xf32>
      %24 = vector.shape_cast %23 : vector<8xf32> to vector<8x1xf32>
      %25 = arith.mulf %20, %20 : vector<8x128xf32>
      %cst_25 = arith.constant dense<0.000000e+00> : vector<8xf32>
      %26 = vector.multi_reduction <add>, %25, %cst_25 [1] : vector<8x128xf32> to vector<8xf32>
      %27 = vector.shape_cast %26 : vector<8xf32> to vector<8x1xf32>
      %28 = arith.mulf %21, %21 : vector<8x128xf32>
      %cst_26 = arith.constant dense<0.000000e+00> : vector<8xf32>
      %29 = vector.multi_reduction <add>, %28, %cst_26 [1] : vector<8x128xf32> to vector<8xf32>
      %30 = vector.shape_cast %29 : vector<8xf32> to vector<8x1xf32>
      %31 = arith.mulf %27, %30 : vector<8x1xf32>
      %cst_27 = arith.constant 1.000000e-16 : f32
      %32 = vector.broadcast %cst_27 : f32 to vector<8x1xf32>
      %33 = arith.maximumf %31, %32 : vector<8x1xf32>
      %34 = math.rsqrt %33 : vector<8x1xf32>
      %35 = arith.mulf %24, %34 : vector<8x1xf32>
      %c0_28 = arith.constant 0 : index
      %c0_29 = arith.constant 0 : index
      %36 = vector.load %arg8[%c0_28, %c0_29] : memref<8x1xf32, #tpu.memory_space<vmem>>, vector<8x1xf32>
      tpu.vector_store %arg8[%c0_28, %c0_29], %35 {strides = array<i32>} : memref<8x1xf32, #tpu.memory_space<vmem>>, vector<8x1xf32>,
    } else {
    }
    %c0 = arith.constant 0 : index
    %c0_1 = arith.constant 0 : index
    %c0_2 = arith.constant 0 : index
    %3 = vector.load %arg4[%c0, %c0_1, %c0_2] : memref<8x4x128xf32, #tpu.memory_space<vmem>>, vector<8x4x128xf32>
    %c0_3 = arith.constant 0 : index
    %c0_4 = arith.constant 0 : index
    %4 = vector.load %arg6[%c0_3, %c0_4] : memref<8x128xf32, #tpu.memory_space<vmem>>, vector<8x128xf32>
    %cst = arith.constant dense<0.000000e+00> : vector<8x128xf32>
    %5 = vector.multi_reduction <add>, %3, %cst [1] : vector<8x4x128xf32> to vector<8x128xf32>
    %6 = arith.addf %4, %5 : vector<8x128xf32>
    %c0_5 = arith.constant 0 : index
    %c0_6 = arith.constant 0 : index
    %7 = vector.load %arg6[%c0_5, %c0_6] : memref<8x128xf32, #tpu.memory_space<vmem>>, vector<8x128xf32>
    tpu.vector_store %arg6[%c0_5, %c0_6], %6 {strides = array<i32>} : memref<8x128xf32, #tpu.memory_space<vmem>>, vector<8x128xf32>,
    %c0_7 = arith.constant 0 : index
    %c0_8 = arith.constant 0 : index
    %8 = vector.load %arg7[%c0_7, %c0_8] : memref<8x128xf32, #tpu.memory_space<vmem>>, vector<8x128xf32>
    %9 = arith.mulf %3, %3 : vector<8x4x128xf32>
    %cst_9 = arith.constant dense<0.000000e+00> : vector<8x128xf32>
    %10 = vector.multi_reduction <add>, %9, %cst_9 [1] : vector<8x4x128xf32> to vector<8x128xf32>
    %11 = arith.addf %8, %10 : vector<8x128xf32>
    %c0_10 = arith.constant 0 : index
    %c0_11 = arith.constant 0 : index
    %12 = vector.load %arg7[%c0_10, %c0_11] : memref<8x128xf32, #tpu.memory_space<vmem>>, vector<8x128xf32>
    tpu.vector_store %arg7[%c0_10, %c0_11], %11 {strides = array<i32>} : memref<8x128xf32, #tpu.memory_space<vmem>>, vector<8x128xf32>,
    %c0_i32_12 = arith.constant 0 : i32
    %13 = arith.cmpi eq, %arg1, %c0_i32_12 : i32
    %14 = arith.extui %13 : i1 to i32
    %c0_i32_13 = arith.constant 0 : i32
    %15 = arith.cmpi ne, %14, %c0_i32_13 : i32
    scf.if %15 {
      %c0_14 = arith.constant 0 : index
      %c0_15 = arith.constant 0 : index
      %16 = vector.load %arg2[%c0_14, %c0_15] : memref<8x128xf32, #tpu.memory_space<vmem>>, vector<8x128xf32>
      %c0_16 = arith.constant 0 : index
      %c0_17 = arith.constant 0 : index
      %17 = vector.load %arg6[%c0_16, %c0_17] : memref<8x128xf32, #tpu.memory_space<vmem>>, vector<8x128xf32>
      %c0_18 = arith.constant 0 : index
      %c0_19 = arith.constant 0 : index
      %18 = vector.load %arg7[%c0_18, %c0_19] : memref<8x128xf32, #tpu.memory_space<vmem>>, vector<8x128xf32>
      %19 = arith.mulf %16, %17 : vector<8x128xf32>
      %20 = arith.mulf %16, %16 : vector<8x128xf32>
      %cst_20 = arith.constant 4.000000e+00 : f32
      %21 = vector.broadcast %cst_20 : f32 to vector<8x128xf32>
      %22 = arith.mulf %20, %21 : vector<8x128xf32>
      %23 = arith.mulf %22, %18 : vector<8x128xf32>
      %cst_21 = arith.constant 1.000000e-16 : f32
      %24 = vector.broadcast %cst_21 : f32 to vector<8x128xf32>
      %25 = arith.maximumf %23, %24 : vector<8x128xf32>
      %26 = math.rsqrt %25 : vector<8x128xf32>
      %27 = arith.mulf %19, %26 : vector<8x128xf32>
      %cst_22 = arith.constant dense<0.000000e+00> : vector<8xf32>
      %28 = vector.multi_reduction <add>, %27, %cst_22 [1] : vector<8x128xf32> to vector<8xf32>
      %29 = vector.shape_cast %28 : vector<8xf32> to vector<8x1xf32>
      %cst_23 = arith.constant 7.812500e-03 : f32
      %30 = vector.broadcast %cst_23 : f32 to vector<8x1xf32>
      %31 = arith.mulf %29, %30 : vector<8x1xf32>
      %cst_24 = arith.constant 2.000000e-01 : f32
      %32 = vector.broadcast %cst_24 : f32 to vector<8x1xf32>
      %33 = arith.addf %32, %31 : vector<8x1xf32>
      %c0_25 = arith.constant 0 : index
      %c0_26 = arith.constant 0 : index
      %34 = vector.load %arg8[%c0_25, %c0_26] : memref<8x1xf32, #tpu.memory_space<vmem>>, vector<8x1xf32>
      %35 = arith.subf %33, %34 : vector<8x1xf32>
      %cst_27 = arith.constant 0.000000e+00 : f32
      %36 = vector.broadcast %cst_27 : f32 to vector<8x1xf32>
      %37 = arith.maximumf %35, %36 : vector<8x1xf32>
      %38 = vector.shape_cast %37 : vector<8x1xf32> to vector<8x1xf32>
      %39 = vector.broadcast %38 : vector<8x1xf32> to vector<8x128xf32>
      %c0_28 = arith.constant 0 : index
      %c0_29 = arith.constant 0 : index
      %40 = vector.load %arg5[%c0_28, %c0_29] : memref<8x128xf32, #tpu.memory_space<vmem>>, vector<8x128xf32>
      tpu.vector_store %arg5[%c0_28, %c0_29], %39 {strides = array<i32>} : memref<8x128xf32, #tpu.memory_space<vmem>>, vector<8x128xf32>,
    } else {
    }
    return
  }
  func.func @transform_0(%arg0: i32, %arg1: i32) -> (i32, i32) {
    %c0_i32 = arith.constant 0 : i32
    %c0_i32_0 = arith.constant 0 : i32
    return %arg0, %c0_i32 : i32, i32
  }
  func.func @transform_1(%arg0: i32, %arg1: i32) -> (i32, i32) {
    %c0_i32 = arith.constant 0 : i32
    %c0_i32_0 = arith.constant 0 : i32
    return %arg0, %c0_i32 : i32, i32
  }
  func.func @transform_2(%arg0: i32, %arg1: i32) -> (i32, i32, i32) {
    %c0_i32 = arith.constant 0 : i32
    %c0_i32_0 = arith.constant 0 : i32
    return %arg0, %arg1, %c0_i32 : i32, i32, i32
  }
  func.func @transform_3(%arg0: i32, %arg1: i32) -> (i32, i32) {
    %c0_i32 = arith.constant 0 : i32
    %c0_i32_0 = arith.constant 0 : i32
    return %arg0, %c0_i32 : i32, i32
  }
}

</mosaic_0001>

<bundles_post_ra>
// kernel: tpu_custom_call.1
= control target key start
LH: loop header
LB: loop body
LE: loop exit
PB: predicated region body
PF: predicated region fallthrough
CT: control target
= control target key end

     0   :  { %8 = vsyncpa [#allocation6], 0  ;;  %s547_s0 = inlined_call_operand.hbm [shape: f32[8,128], index: 0, kind: input, shape index: {}]   ;;  %s548_s1 = inlined_call_operand.hbm [shape: f32[8,128], index: 1, kind: input, shape index: {}]   ;;  %s549_s2 = inlined_call_operand.hbm [shape: f32[8,4,128], index: 2, kind: input, shape index: {}]   ;;  %s550_s3 = inlined_call_operand.hbm [shape: f32[8,128], index: 3, kind: output, shape index: {}]  }
   0x1   :  { %9 = vsyncpa [#allocation9], 0  ;;  %s27_s14 = sshll.u32 %s548_s1, 4  ;;  %s28_s14 = int_to_ptr.hbm [resolvable:$true] %s27_s14 }
   0x2   :  { %10 = vsyncpa [#allocation7], 0  ;;  %s432_s15 = smov [#allocation8]   ;;  %s16_s19 = sshll.u32 %s547_s0, 4  ;;  %s17_s19 = int_to_ptr.hbm [resolvable:$true] %s16_s19 }
   0x3   :  { %s29_s16 = sshll.u32 %s432_s15, 4  ;;  %s433_s20 = smov [#allocation5]   ;;  %s30_s16 = int_to_ptr.vmem [resolvable:$true] %s29_s16 }
   0x4   :  { %32 = dma.hbm_to_vmem [thread:$0]  %s28_s14, 128, %s30_s16, [#allocation9]  }
   0x5   :  { %s18_s21 = sshll.u32 %s433_s20, 4  ;;  %s37_s24 = sshll.u32 %s549_s2, 4  ;;  %s19_s21 = int_to_ptr.vmem [resolvable:$true] %s18_s21  ;;  %s38_s24 = int_to_ptr.hbm [resolvable:$true] %s37_s24 }
   0x6   :  { %21 = dma.hbm_to_vmem [thread:$0]  %s17_s19, 128, %s19_s21, [#allocation6]  }
   0x7   :  { %s434_s1 = smov [#allocation10]   ;;  %s435_s26 = smov 64  }
   0x8   :  { %s39_s25 = sshll.u32 %s434_s1, 4  ;;  %s436_s27 = smov 4   ;;  %s40_s25 = int_to_ptr.vmem [resolvable:$true] %s39_s25 }
   0x9   :  { %45 = dma.hbm_to_vmem [thread:$0]  %s38_s24, 512, %s40_s25, [#allocation9], %s435_s26, %s435_s26, %s436_s27  }
   0xa   :  { %426 = dma.done.wait [#allocation6], 128  }
   0xb   :  { %427 = vsyncadd [#allocation6], 4294967168 }
   0xc   :  { %428 = dma.done.wait [#allocation9], 640  }
   0xd   :  { %429 = vsyncadd [#allocation9], 4294966656  ;;  %v468_v0 = vld [vmem:[#allocation5] sm:$0xff]  ;;  %v65_v1 = vld [vmem:[#allocation8] sm:$0xff]  ;;  %vm99_vm0 = vcmask 1043456   ;;  %vm164_vm1 = vcmask 1041409  }
   0xe   :  { %v472_v2 = vmul.f32 %v468_v0, %v468_v0  ;;  %v66_v3 = vmul.f32 %v65_v1, %v468_v0  ;;  %v90_v4 = vld [vmem:[#allocation10] sm:$0xf]  ;;  %v91_v5 = vld [vmem:[#allocation10 + $0x4] sm:$0xf]  ;;  %v92_v6 = vld [vmem:[#allocation10 + $0x8] sm:$0xf]  ;;  %v72_v16 = vmul.f32 %v65_v1, %v65_v1 }
   0xf   :  { %v93_v7 = vld [vmem:[#allocation10 + $0xc] sm:$0xf]  ;;  %v100_v8 = vsel %vm99_vm0, %v90_v4, 0.0  ;;  %v107_v9 = vsel %vm99_vm0, %v91_v5, 0.0  ;;  %v114_v10 = vsel %vm99_vm0, %v92_v6, 0.0  ;;  %v182_v36 = vmul.f32 %v90_v4, %v90_v4  ;;  %s438_s0 = smov [#allocation11]  }
  0x10   :  { %70 = vadd.xlane.f32.xlu0 %v472_v2  ;;  %67 = vadd.xlane.f32.xlu1 %v66_v3  ;;  %v121_v11 = vsel %vm99_vm0, %v93_v7, 0.0  ;;  %v101_v12 = vrot.slane %v100_v8, 4  ;;  %v108_v13 = vrot.slane %v107_v9, 4  ;;  %v115_v14 = vrot.slane %v114_v10, 4  ;;  %v94_v17 = vld [vmem:[#allocation10 + $0x10] sm:$0xf] }
  0x11   :  { %v122_v15 = vrot.slane %v121_v11, 4  ;;  %v95_v18 = vld [vmem:[#allocation10 + $0x14] sm:$0xf]  ;;  %v128_v19 = vsel %vm99_vm0, %v94_v17, 0.0  ;;  %v96_v20 = vld [vmem:[#allocation10 + $0x18] sm:$0xf]  ;;  %v183_v37 = vmul.f32 %v91_v5, %v91_v5  ;;  %v184_v39 = vmul.f32 %v92_v6, %v92_v6 }
  0x12   :  { %v102_v21 = vadd.f32 %v101_v12, %v100_v8  ;;  %v109_v22 = vadd.f32 %v108_v13, %v107_v9  ;;  %v116_v23 = vadd.f32 %v115_v14, %v114_v10  ;;  %v135_v24 = vsel %vm99_vm0, %v95_v18, 0.0  ;;  %v97_v27 = vld [vmem:[#allocation10 + $0x1c] sm:$0xf]  ;;  %s304_s2 = sshll.u32 %s438_s0, 4  ;;  %s306_s30 = sshll.u32 %s550_s3, 4  ;;  %s305_s2 = int_to_ptr.vmem [resolvable:$true] %s304_s2  ;;  %s307_s30 = int_to_ptr.hbm [resolvable:$true] %s306_s30 }
  0x13   :  { %v123_v25 = vadd.f32 %v122_v15, %v121_v11  ;;  %v142_v26 = vsel %vm99_vm0, %v96_v20, 0.0  ;;  %v129_v28 = vrot.slane %v128_v19, 4  ;;  %v136_v29 = vrot.slane %v135_v24, 4 }
  0x14   :  { %v484_v30 = vsel %vm99_vm0, %v97_v27, 0.0  ;;  %v103_v31 = vrot.slane %v102_v21, 2  ;;  %v110_v32 = vrot.slane %v109_v22, 2  ;;  %v117_v33 = vrot.slane %v116_v23, 2 }
  0x15   :  { %v143_v34 = vrot.slane %v142_v26, 4  ;;  %v124_v35 = vrot.slane %v123_v25, 2  ;;  %v486_v38 = vadd.f32 %v129_v28, %v128_v19  ;;  %v488_v40 = vadd.f32 %v136_v29, %v135_v24 }
  0x16   :  { %v150_v41 = vrot.slane %v484_v30, 4  ;;  %v185_v42 = vmul.f32 %v93_v7, %v93_v7  ;;  %v186_v43 = vmul.f32 %v94_v17, %v94_v17  ;;  %v491_v44 = vadd.f32 %v103_v31, %v102_v21 }
  0x17   :  { %v493_v45 = vadd.f32 %v110_v32, %v109_v22  ;;  %v495_v46 = vadd.f32 %v117_v33, %v116_v23  ;;  %v497_v47 = vadd.f32 %v143_v34, %v142_v26  ;;  %v499_v48 = vadd.f32 %v124_v35, %v123_v25 }
  0x18   :  { %73 = vadd.xlane.f32.xlu0 %v72_v16  ;;  %v187_v49 = vmul.f32 %v95_v18, %v95_v18  ;;  %v190_v50 = vsel %vm99_vm0, %v182_v36, 0.0  ;;  %v197_v51 = vsel %vm99_vm0, %v183_v37, 0.0  ;;  %v131_v52 = vrot.slane %v486_v38, 2 }
  0x19   :  { %v191_v53 = vrot.slane %v190_v50, 4  ;;  %v198_v54 = vrot.slane %v197_v51, 4  ;;  %v204_v55 = vsel %vm99_vm0, %v184_v39, 0.0  ;;  %v188_v56 = vmul.f32 %v96_v20, %v96_v20 }
  0x1a   :  { %v205_v57 = vrot.slane %v204_v55, 4  ;;  %v211_v58 = vsel %vm99_vm0, %v185_v42, 0.0  ;;  %v218_v59 = vsel %vm99_vm0, %v186_v43, 0.0  ;;  %v105_v60 = vrot.slane %v491_v44, 1 }
  0x1b   :  { %vm166_vm2 = vcmask 1042434   ;;  %v192_v61 = vadd.f32 %v191_v53, %v190_v50  ;;  %v199_v62 = vadd.f32 %v198_v54, %v197_v51  ;;  %v212_v63 = vrot.slane %v211_v58, 4 }
  0x1c   :  { %vm168_vm3 = vcmask 1043459   ;;  %v189_v1 = vmul.f32 %v97_v27, %v97_v27  ;;  %v206_v3 = vadd.f32 %v205_v57, %v204_v55  ;;  %v219_v4 = vrot.slane %v218_v59, 4 }
  0x1d   :  { %v225_v5 = vsel %vm99_vm0, %v187_v49, 0.0  ;;  %v112_v6 = vrot.slane %v493_v45, 1  ;;  %vm170_vm4 = vcmask 1044484   ;;  %v193_v7 = vrot.slane %v192_v61, 2 }
  0x1e   :  { %v200_v8 = vrot.slane %v199_v62, 2  ;;  %v213_v9 = vadd.f32 %v212_v63, %v211_v58  ;;  %v207_v10 = vrot.slane %v206_v3, 2  ;;  %v220_v11 = vadd.f32 %v219_v4, %v218_v59 }
  0x1f   :  { %v226_v12 = vrot.slane %v225_v5, 4  ;;  %v232_v13 = vsel %vm99_vm0, %v188_v56, 0.0  ;;  %vm172_vm5 = vcmask 1045509   ;;  %v194_v14 = vadd.f32 %v193_v7, %v192_v61 }
  0x20   :  { %v201_v15 = vadd.f32 %v200_v8, %v199_v62  ;;  %v214_v16 = vrot.slane %v213_v9, 2  ;;  %v233_v17 = vrot.slane %v232_v13, 4  ;;  %vm174_vm6 = vcmask 1046534  }
  0x21   :  { %v208_v18 = vadd.f32 %v207_v10, %v206_v3  ;;  %v221_v19 = vrot.slane %v220_v11, 2  ;;  %v227_v20 = vadd.f32 %v226_v12, %v225_v5  ;;  %v239_v21 = vsel %vm99_vm0, %v189_v1, 0.0 }
  0x22   :  { %v195_v22 = vrot.slane %v194_v14, 1  ;;  %v202_v23 = vrot.slane %v201_v15, 1  ;;  %v215_v24 = vadd.f32 %v214_v16, %v213_v9  ;;  %v234_v25 = vadd.f32 %v233_v17, %v232_v13 }
  0x23   :  { %v209_v26 = vrot.slane %v208_v18, 1  ;;  %v222_v27 = vadd.f32 %v221_v19, %v220_v11  ;;  %v228_v28 = vrot.slane %v227_v20, 2  ;;  %v240_v29 = vrot.slane %v239_v21, 4 }
  0x24   :  { %v196_v31 = vadd.f32 %v195_v22, %v194_v14  ;;  %v203_v32 = vadd.f32 %v202_v23, %v201_v15  ;;  %v216_v33 = vrot.slane %v215_v24, 1  ;;  %v235_v34 = vrot.slane %v234_v25, 2 }
  0x25   :  { %v210_v35 = vadd.f32 %v209_v26, %v208_v18  ;;  %v223_v36 = vrot.slane %v222_v27, 1  ;;  %v229_v37 = vadd.f32 %v228_v28, %v227_v20  ;;  %v241_v39 = vadd.f32 %v240_v29, %v239_v21 }
  0x26   :  { %v138_v42 = vrot.slane %v488_v40, 2  ;;  %v217_v43 = vadd.f32 %v216_v33, %v215_v24  ;;  %v236_v49 = vadd.f32 %v235_v34, %v234_v25  ;;  %v254_v50 = vsel %vm164_vm1, %v203_v32, %v196_v31 }
  0x27   :  { %v224_v51 = vadd.f32 %v223_v36, %v222_v27  ;;  %v230_v53 = vrot.slane %v229_v37, 1  ;;  %v242_v54 = vrot.slane %v241_v39, 2  ;;  %v255_v55 = vsel %vm166_vm2, %v210_v35, %v254_v50 }
  0x28   :  { %v106_v56 = vadd.f32 %v105_v60, %v491_v44  ;;  %v119_v57 = vrot.slane %v495_v46, 1  ;;  %v237_v58 = vrot.slane %v236_v49, 1  ;;  %v256_v59 = vsel %vm168_vm3, %v217_v43, %v255_v55 }
  0x29   :  { %v113_v61 = vadd.f32 %v112_v6, %v493_v45  ;;  %v231_v62 = vadd.f32 %v230_v53, %v229_v37  ;;  %v243_v63 = vadd.f32 %v242_v54, %v241_v39  ;;  %v257_v1 = vsel %vm170_vm4, %v224_v51, %v256_v59 }
  0x2a   :  { %v132_v3 = vadd.f32 %v131_v52, %v486_v38  ;;  %vm176_vm7 = vcmask 1047559   ;;  %v238_v4 = vadd.f32 %v237_v58, %v236_v49  ;;  %v126_v5 = vrot.slane %v499_v48, 1 }
  0x2b   :  { %v151_v44 = vadd.f32 %v150_v41, %v484_v30  ;;  %v244_v60 = vrot.slane %v243_v63, 1  ;;  %v258_v7 = vsel %vm172_vm5, %v231_v62, %v257_v1  ;;  %v120_v45 = vadd.f32 %v119_v57, %v495_v46 }
  0x2c   :  { %v145_v6 = vrot.slane %v497_v47, 2  ;;  %v259_v8 = vsel %vm174_vm6, %v238_v4, %v258_v7  ;;  %v272_v9 = vmul.f32 4.0, %v472_v2  ;;  %v139_v38 = vadd.f32 %v138_v42, %v488_v40 }
  0x2d   :  { %v165_v52 = vsel %vm164_vm1, %v113_v61, %v106_v56  ;;  %v245_v10 = vadd.f32 %v244_v60, %v243_v63  ;;  %v133_v11 = vrot.slane %v132_v3, 1  ;;  %v127_v12 = vadd.f32 %v126_v5, %v499_v48 }
  0x2e   :  { %v152_v30 = vrot.slane %v151_v44, 2  ;;  %v146_v13 = vadd.f32 %v145_v6, %v497_v47  ;;  %v167_v46 = vsel %vm166_vm2, %v120_v45, %v165_v52  ;;  %v140_v15 = vrot.slane %v139_v38, 1 }
  0x2f   :  { %v260_v41 = vsel %vm176_vm7, %v245_v10, %v259_v8  ;;  %v134_v16 = vadd.f32 %v133_v11, %v132_v3  ;;  %v169_v40 = vsel %vm168_vm3, %v127_v12, %v167_v46  ;;  %vm88_vm14 = vcmask 7168  }
  0x30   :  { %v273_v14 = vmul.f32 %v272_v9, %v260_v41  ;;  %v153_v2 = vadd.f32 %v152_v30, %v151_v44  ;;  %v147_v18 = vrot.slane %v146_v13, 1  ;;  %v141_v19 = vadd.f32 %v140_v15, %v139_v38 }
  0x31   :  { %v171_v20 = vsel %vm170_vm4, %v134_v16, %v169_v40  ;;  %v437_v56 = vmov 0  }
  0x32   :  { %v274_v17 = vmax.f32 %v273_v14, 1e-16  ;;  %v154_v48 = vrot.slane %v153_v2, 1  ;;  %v148_v21 = vadd.f32 %v147_v18, %v146_v13  ;;  %v173_v22 = vsel %vm172_vm5, %v141_v19, %v171_v20  ;;  %324 = vset.pattern.permute.xlu2 %v437_v56  ;;  %325 = vset.pattern.permute.xlu0 %v437_v56 }
  0x34   :  { %326 = vrsqrt.f32 %v274_v17  ;;  %v155_v47 = vadd.f32 %v154_v48, %v153_v2  ;;  %v175_v25 = vsel %vm174_vm6, %v148_v21, %v173_v22  ;;  %vm281_vm8 = vweird.f32 %v274_v17 }
  0x36   :  { %v177_v27 = vsel %vm176_vm7, %v155_v47, %v175_v25 }
  0x37   :  { %v270_v31 = vmul.f32 %v177_v27, %v468_v0 }
  0x3a   :  { %v327_v23 = vpop.eup %326 }
  0x3b   :  { %v276_v24 = vmul.f32 %v327_v23, %v274_v17  ;;  %vm282_vm9 = vweird.f32 %v327_v23 }
  0x3c   :  { %vm283_vm10 = vmor %vm281_vm8, %vm282_vm9 }
  0x3d   :  { %v277_v26 = vmul.f32 %v327_v23, %v276_v24 }
  0x3f   :  { %v278_v28 = vmul.f32 0.5, %v277_v26 }
  0x41   :  { %v279_v29 = vsub.f32 1.5, %v278_v28 }
  0x43   :  { %v280_v32 = vmul.f32 %v327_v23, %v279_v29 }
  0x45   :  { %v284_v33 = vsel %vm283_vm10, %v327_v23, %v280_v32 }
  0x46   :  { %v285_v34 = vmul.f32 %v284_v33, %v270_v31 }
  0x48   :  { %286 = vadd.xlane.f32.xlu1 %v285_v34 }
  0x83   :  { %v71_v35 = vpop.xlane.xlu0 %70  ;;  %v68_v54 = vpop.xlane.xlu1 %67 }
  0x8b   :  { %v74_v36 = vpop.xlane.xlu0 %73 }
  0x8c   :  { %v75_v37 = vmul.f32 %v74_v36, %v71_v35 }
  0x8e   :  { %v76_v39 = vmax.f32 %v75_v37, 1e-16 }
  0x90   :  { %328 = vrsqrt.f32 %v76_v39  ;;  %vm83_vm12 = vweird.f32 %v76_v39 }
  0x96   :  { %v329_v42 = vpop.eup %328 }
  0x97   :  { %v78_v43 = vmul.f32 %v329_v42, %v76_v39  ;;  %vm84_vm11 = vweird.f32 %v329_v42 }
  0x98   :  { %vm85_vm13 = vmor %vm83_vm12, %vm84_vm11 }
  0x99   :  { %v79_v49 = vmul.f32 %v329_v42, %v78_v43 }
  0x9b   :  { %v80_v50 = vmul.f32 0.5, %v79_v49 }
  0x9d   :  { %v81_v51 = vsub.f32 1.5, %v80_v50 }
  0x9f   :  { %v82_v53 = vmul.f32 %v329_v42, %v81_v51 }
  0xa1   :  { %v86_v0 = vsel %vm85_vm13, %v329_v42, %v82_v53 }
  0xa2   :  { %v87_v55 = vmul.f32 %v86_v0, %v68_v54 }
  0xa4   :  { %89 = vst.msk [vmem:[#allocation4] sm:$0xff] %vm88_vm14, %v87_v55 }
  0xab   :  { %v290_v61 = vld [vmem:[#allocation4] sm:$0xff] }
  0xbb   :  { %v287_v57 = vpop.xlane.xlu1 %286 }
  0xbc   :  { %v288_v58 = vmul.f32 0.0078125, %v287_v57 }
  0xbe   :  { %v289_v59 = vadd.f32 0.2, %v288_v58 }
  0xc0   :  { %v291_v62 = vsub.f32 %v289_v59, %v290_v61 }
  0xc2   :  { %v292_v63 = vmax.f32 %v291_v62, 0.0 }
  0xc4   :  { %295 = vperm.xlu2 %324, %v292_v63  }
 0x11e   :  { %v296_v1 = vpop.permute.xlu2 %295 }
 0x11f   :  { %298 = vst [vmem:[#allocation11] sm:$0xff] %v296_v1 }
 0x120   :  { %309 = dma.vmem_to_hbm [thread:$0]  %s305_s2, 128, %s307_s30, [#allocation7]  }
 0x121   :  { %430 = dma.done.wait [#allocation7], 128  }
 0x122   :  { %431 = vsyncadd [#allocation7], 4294967168 }
 0x123   :  { %314 = vsyncpa [#allocation6], 1 }
 0x124   :  { %315 = vsyncpa [#allocation9], 1 }
 0x125   :  { %316 = vsyncpa [#allocation7], 1 }

</bundles_post_ra>
